<compile_context>
chip_gen: v7x
topology: tpu7x:2x2x1
jax: 0.10.0
libtpu: 0.0.40
codegen_flags: <defaults>
</compile_context>

<pallas_src>
import math

import jax
import jax.numpy as jnp
from jax.experimental import pallas as pl
from jax.experimental.pallas import tpu as pltpu


def _round_up(x, m):
    return ((x + m - 1) // m) * m


def _nbytes(shape, dt):
    return math.prod(shape) * jnp.dtype(dt).itemsize


def fea2weight_kernel(x_ref, w1_ref, b1_ref, w2_ref, b2_ref, o_ref, h_ref):
    # Layer 1 once per row tile (j == 0), cached in VMEM scratch in the
    # layer-2 compute dtype so the cast also happens exactly once.
    @pl.when(pl.program_id(1) == 0)
    def _():
        h = jnp.dot(x_ref[...], w1_ref[...],
                    preferred_element_type=jnp.float32)          # f32 MXU
        h_ref[...] = jnp.maximum(h + b1_ref[...], 0.0).astype(h_ref.dtype)

    # Layer 2 on this out_dim column slab (MXU, f32 accumulation).
    out = jnp.dot(h_ref[...], w2_ref[...],
                  preferred_element_type=jnp.float32)
    o_ref[...] = (out + b2_ref[...]).astype(o_ref.dtype)          # lane-dense


def _choose_tiles(N, out_dim, tm_max, tn_max):
    """Pick (tm, tn, n_pad, out_pad). out_pad is always round_up(out_dim,128)."""
    out_128 = _round_up(out_dim, 128)
    tn_max = max(128, (tn_max // 128) * 128)

    if out_128 <= min(2048, tn_max):
        # Fast path: whole out_dim in one column tile -> j-extent 1, weights
        # grid-invariant, layer 1 exactly once per row tile.
        tn = out_128
    else:
        # Largest multiple-of-128 divisor of out_128 that is <= tn_max: no
        # zero-column padding beyond the 128 alignment.
        q = out_128 // 128
        d_max = min(16, tn_max // 128, q)
        d = 1
        for cand in range(d_max, 0, -1):
            if q % cand == 0:
                d = cand
                break
        tn = 128 * d

    # Row tile: big (amortizes W2 re-streaming), 16-aligned (bf16 sublane
    # packing on v5e), bounded so the f32 output temporary stays <= ~8 MiB.
    tm_cap = max(16, (8 << 20) // (tn * 4))
    tm = min(tm_max, tm_cap, _round_up(N, 16))
    tm = max(16, (tm // 16) * 16)

    n_pad = _round_up(N, tm)
    return tm, tn, n_pad, out_128


def fea2weight(x, w1, b1, w2, b2, *, tm_max=512, tn_max=2048,
               compute_dtype=jnp.bfloat16):
    """Meta-SR Fea2Weight forward: (N, feat) -> (N, K*K*inC*outC)."""
    N, feat = x.shape
    hidden = w1.shape[1]
    out_dim = w2.shape[1]
    out_dtype = x.dtype

    tm, tn, n_pad, out_pad = _choose_tiles(N, out_dim, tm_max, tn_max)

    # ---- operand prep (zero padding only where cheap) ------------------------
    # Layer 1 stays in f32 for accuracy (feat is tiny, cost negligible).
    xp = x.astype(jnp.float32)
    if n_pad != N:
        xp = jnp.pad(xp, ((0, n_pad - N), (0, 0)))
    w1c = w1.astype(jnp.float32)
    b1c = b1.astype(jnp.float32).reshape(1, hidden)
    # Layer-2 operands in compute_dtype (bf16 default), f32 accumulation.
    w2c = w2.astype(compute_dtype)
    b2c = b2.astype(jnp.float32).reshape(1, out_dim)
    if out_pad != out_dim:  # <= 127 zero columns; padded outputs sliced off.
        w2c = jnp.pad(w2c, ((0, 0), (0, out_pad - out_dim)))
        b2c = jnp.pad(b2c, ((0, 0), (0, out_pad - out_dim)))

    grid = (n_pad // tm, out_pad // tn)

    # ---- VMEM budget (blocks double-buffered + scratch + f32 temporaries) ----
    blocks = (2 * _nbytes((tm, feat), jnp.float32)
              + _nbytes((feat, hidden), jnp.float32)
              + _nbytes((1, hidden), jnp.float32)
              + 2 * _nbytes((hidden, tn), compute_dtype)
              + 2 * _nbytes((1, tn), jnp.float32)
              + 2 * _nbytes((tm, tn), out_dtype))
    scratch = _nbytes((tm, hidden), compute_dtype)
    temps = _nbytes((tm, hidden), jnp.float32) + _nbytes((tm, tn), jnp.float32)
    vmem_limit = int(min(max(blocks + scratch + temps + (4 << 20), 16 << 20),
                         56 << 20))  # stay under v7x's 64 MiB physical VMEM

    cost = pl.CostEstimate(
        flops=2 * N * (feat * hidden + hidden * out_dim),
        transcendentals=0,
        bytes_accessed=(x.size * x.dtype.itemsize
                        + w1.size * w1.dtype.itemsize
                        + w2.size * w2.dtype.itemsize
                        + N * out_dim * jnp.dtype(out_dtype).itemsize),
    )

    out_padded = pl.pallas_call(
        fea2weight_kernel,
        out_shape=jax.ShapeDtypeStruct((n_pad, out_pad), out_dtype),
        grid_spec=pltpu.PrefetchScalarGridSpec(
            num_scalar_prefetch=0,
            grid=grid,
            in_specs=[
                pl.BlockSpec((tm, feat), lambda i, j: (i, 0)),      # x row tile
                pl.BlockSpec((feat, hidden), lambda i, j: (0, 0)),  # W1 (invariant)
                pl.BlockSpec((1, hidden), lambda i, j: (0, 0)),     # b1
                pl.BlockSpec((hidden, tn), lambda i, j: (0, j)),    # W2 col slab
                pl.BlockSpec((1, tn), lambda i, j: (0, j)),         # b2 slab
            ],
            out_specs=pl.BlockSpec((tm, tn), lambda i, j: (i, j)),  # lane-dense
            scratch_shapes=[pltpu.VMEM((tm, hidden), compute_dtype)],  # h cache
        ),
        compiler_params=pltpu.CompilerParams(
            # j must iterate sequentially per row tile so the h-cache written
            # at j==0 is valid; rows can be sharded across TensorCores.
            dimension_semantics=("parallel", "arbitrary"),
            vmem_limit_bytes=vmem_limit),
        cost_estimate=cost,
    )(xp, w1c, b1c, w2c, b2c)

    return out_padded[:N, :out_dim]


def init_params(key, feature_num, inC, kernel_size, outC, hidden=256,
                dtype=jnp.float32):
    """Deterministic init matching nn.Linear shapes (transposed for x@W)."""
    out_dim = kernel_size * kernel_size * inC * outC
    k1, k2, k3, k4 = jax.random.split(key, 4)
    # torch default init: U(-1/sqrt(fan_in), 1/sqrt(fan_in))
    lim1 = 1.0 / jnp.sqrt(feature_num)
    lim2 = 1.0 / jnp.sqrt(hidden)
    w1 = jax.random.uniform(k1, (feature_num, hidden), dtype, -lim1, lim1)
    b1 = jax.random.uniform(k2, (1, hidden), dtype, -lim1, lim1)
    w2 = jax.random.uniform(k3, (hidden, out_dim), dtype, -lim2, lim2)
    b2 = jax.random.uniform(k4, (1, out_dim), dtype, -lim2, lim2)
    return w1, b1, w2, b2


if __name__ == "__main__":
    key = jax.random.PRNGKey(0)
    kx, kp = jax.random.split(key)

    # ---- Case 1: module-consistent small shapes (single out_dim tile) -------
    feature_num = 8
    inC, kernel_size, outC = 4, 3, 3
    N = 37  # not a multiple of 8/128 -> exercises row padding
    out_dim = kernel_size * kernel_size * inC * outC  # 108

    x = jax.random.normal(kx, (N, feature_num), jnp.float32)
    w1, b1, w2, b2 = init_params(kp, feature_num, inC, kernel_size, outC)
    ref = jnp.maximum(x @ w1 + b1, 0.0) @ w2 + b2

    # f32 compute path: strict check vs. pure-JAX reference.
    out_f32 = jax.block_until_ready(
        fea2weight(x, w1, b1, w2, b2, compute_dtype=jnp.float32))
    assert out_f32.shape == (N, out_dim)
    assert jnp.allclose(out_f32, ref, atol=1e-5, rtol=1e-5)

    # Default path: f32 layer 1, bf16 layer-2 operands, f32 accumulation.
    out_mix = jax.block_until_ready(fea2weight(x, w1, b1, w2, b2))
    assert out_mix.shape == (N, out_dim)
    assert jnp.allclose(out_mix, ref, atol=3e-2, rtol=3e-2)

    # ---- Case 2: force the 2-D path (multi row tiles, multi out_dim tiles,
    # h-cache reuse across j) with small override tiles -----------------------
    N2, inC2, outC2 = 70, 16, 4            # out_dim = 576 -> padded to 640
    x2 = jax.random.normal(kx, (N2, feature_num), jnp.float32)
    w1b, b1b, w2b, b2b = init_params(kp, feature_num, inC2, kernel_size, outC2)
    ref2 = jnp.maximum(x2 @ w1b + b1b, 0.0) @ w2b + b2b
    out2 = jax.block_until_ready(
        fea2weight(x2, w1b, b1b, w2b, b2b,
                   tm_max=32, tn_max=128, compute_dtype=jnp.float32))
    assert out2.shape == ref2.shape
    assert jnp.allclose(out2, ref2, atol=1e-5, rtol=1e-5)

    print("KERNEL_OK")
</pallas_src>

<mosaic_0001>
module attributes {stable_mosaic.version = 11 : i64} {
  func.func @fea2weight_kernel(%arg0: i32, %arg1: i32, %arg2: memref<48x8xf32, #tpu.memory_space<vmem>>, %arg3: memref<8x256xf32, #tpu.memory_space<vmem>>, %arg4: memref<1x256xf32, #tpu.memory_space<vmem>>, %arg5: memref<256x128xf32, #tpu.memory_space<vmem>>, %arg6: memref<1x128xf32, #tpu.memory_space<vmem>>, %arg7: memref<48x128xf32, #tpu.memory_space<vmem>>, %arg8: memref<48x256xf32, #tpu.memory_space<vmem>>) attributes {dimension_semantics = [#tpu.dimension_semantics<parallel>, #tpu.dimension_semantics<arbitrary>], iteration_bounds = array<i64: 1, 1>, scalar_prefetch = 0 : i64, scratch_operands = 1 : i64, tpu.core_type = #tpu.core_type<tc>, window_params = [{transform_indices = @transform_0, window_bounds = array<i64: 48, 8>}, {pipeline_mode = #tpu.pipeline_mode<synchronous>, transform_indices = @transform_1, window_bounds = array<i64: 8, 256>}, {pipeline_mode = #tpu.pipeline_mode<synchronous>, transform_indices = @transform_2, window_bounds = array<i64: 1, 256>}, {transform_indices = @transform_3, window_bounds = array<i64: 256, 128>}, {transform_indices = @transform_4, window_bounds = array<i64: 1, 128>}, {transform_indices = @transform_5, window_bounds = array<i64: 48, 128>}]} {
    %c0_i32 = arith.constant 0 : i32
    %0 = arith.cmpi eq, %arg1, %c0_i32 : i32
    %1 = arith.extui %0 : i1 to i32
    %c0_i32_0 = arith.constant 0 : i32
    %2 = arith.cmpi ne, %1, %c0_i32_0 : i32
    scf.if %2 {
      %c0_8 = arith.constant 0 : index
      %c0_9 = arith.constant 0 : index
      %10 = vector.load %arg2[%c0_8, %c0_9] : memref<48x8xf32, #tpu.memory_space<vmem>>, vector<48x8xf32>
      %c0_10 = arith.constant 0 : index
      %c0_11 = arith.constant 0 : index
      %11 = vector.load %arg3[%c0_10, %c0_11] : memref<8x256xf32, #tpu.memory_space<vmem>>, vector<8x256xf32>
      %cst_12 = arith.constant dense<0.000000e+00> : vector<48x256xf32>
      %12 = tpu.matmul %10, %11, %cst_12 {dimension_numbers = #tpu.dot_dimension_numbers<[1], [0], [0], [1], [0, 0, 1, 1], [], []>} : vector<48x8xf32>, vector<8x256xf32>, vector<48x256xf32> -> vector<48x256xf32>
      %c0_13 = arith.constant 0 : index
      %c0_14 = arith.constant 0 : index
      %13 = vector.load %arg4[%c0_13, %c0_14] : memref<1x256xf32, #tpu.memory_space<vmem>>, vector<1x256xf32>
      %14 = vector.broadcast %13 : vector<1x256xf32> to vector<48x256xf32>
      %15 = arith.addf %12, %14 : vector<48x256xf32>
      %cst_15 = arith.constant 0.000000e+00 : f32
      %16 = vector.broadcast %cst_15 : f32 to vector<48x256xf32>
      %17 = arith.maximumf %15, %16 : vector<48x256xf32>
      %c0_16 = arith.constant 0 : index
      %c0_17 = arith.constant 0 : index
      %18 = vector.load %arg8[%c0_16, %c0_17] : memref<48x256xf32, #tpu.memory_space<vmem>>, vector<48x256xf32>
      tpu.vector_store %arg8[%c0_16, %c0_17], %17 {strides = array<i32>} : memref<48x256xf32, #tpu.memory_space<vmem>>, vector<48x256xf32>,
    } else {
    }
    %c0 = arith.constant 0 : index
    %c0_1 = arith.constant 0 : index
    %3 = vector.load %arg8[%c0, %c0_1] : memref<48x256xf32, #tpu.memory_space<vmem>>, vector<48x256xf32>
    %c0_2 = arith.constant 0 : index
    %c0_3 = arith.constant 0 : index
    %4 = vector.load %arg5[%c0_2, %c0_3] : memref<256x128xf32, #tpu.memory_space<vmem>>, vector<256x128xf32>
    %cst = arith.constant dense<0.000000e+00> : vector<48x128xf32>
    %5 = tpu.matmul %3, %4, %cst {dimension_numbers = #tpu.dot_dimension_numbers<[1], [0], [0], [1], [0, 0, 1, 1], [], []>} : vector<48x256xf32>, vector<256x128xf32>, vector<48x128xf32> -> vector<48x128xf32>
    %c0_4 = arith.constant 0 : index
    %c0_5 = arith.constant 0 : index
    %6 = vector.load %arg6[%c0_4, %c0_5] : memref<1x128xf32, #tpu.memory_space<vmem>>, vector<1x128xf32>
    %7 = vector.broadcast %6 : vector<1x128xf32> to vector<48x128xf32>
    %8 = arith.addf %5, %7 : vector<48x128xf32>
    %c0_6 = arith.constant 0 : index
    %c0_7 = arith.constant 0 : index
    %9 = vector.load %arg7[%c0_6, %c0_7] : memref<48x128xf32, #tpu.memory_space<vmem>>, vector<48x128xf32>
    tpu.vector_store %arg7[%c0_6, %c0_7], %8 {strides = array<i32>} : memref<48x128xf32, #tpu.memory_space<vmem>>, vector<48x128xf32>,
    return
  }
  func.func @transform_0(%arg0: i32, %arg1: i32) -> (i32, i32) {
    %c0_i32 = arith.constant 0 : i32
    %c0_i32_0 = arith.constant 0 : i32
    return %arg0, %c0_i32 : i32, i32
  }
  func.func @transform_1(%arg0: i32, %arg1: i32) -> (i32, i32) {
    %c0_i32 = arith.constant 0 : i32
    %c0_i32_0 = arith.constant 0 : i32
    %c0_i32_1 = arith.constant 0 : i32
    return %c0_i32, %c0_i32_0 : i32, i32
  }
  func.func @transform_2(%arg0: i32, %arg1: i32) -> (i32, i32) {
    %c0_i32 = arith.constant 0 : i32
    %c0_i32_0 = arith.constant 0 : i32
    %c0_i32_1 = arith.constant 0 : i32
    return %c0_i32, %c0_i32_0 : i32, i32
  }
  func.func @transform_3(%arg0: i32, %arg1: i32) -> (i32, i32) {
    %c0_i32 = arith.constant 0 : i32
    %c0_i32_0 = arith.constant 0 : i32
    return %c0_i32, %arg1 : i32, i32
  }
  func.func @transform_4(%arg0: i32, %arg1: i32) -> (i32, i32) {
    %c0_i32 = arith.constant 0 : i32
    %c0_i32_0 = arith.constant 0 : i32
    return %c0_i32, %arg1 : i32, i32
  }
  func.func @transform_5(%arg0: i32, %arg1: i32) -> (i32, i32) {
    %c0_i32 = arith.constant 0 : i32
    return %arg0, %arg1 : i32, i32
  }
}

</mosaic_0001>

<bundles_post_ra>
// kernel: tpu_custom_call.1
= control target key start
LH: loop header
LB: loop body
LE: loop exit
PB: predicated region body
PF: predicated region fallthrough
CT: control target
= control target key end

     0   :  { %10 = vsyncpa [#allocation4], 0  ;;  %s637_s0 = inlined_call_operand.vmem [shape: f32[48,8], index: 0, kind: input, shape index: {}]   ;;  %s638_s1 = inlined_call_operand.vmem [shape: f32[8,256], index: 1, kind: input, shape index: {}]   ;;  %s639_s2 = inlined_call_operand.vmem [shape: f32[1,256], index: 2, kind: input, shape index: {}]   ;;  %s640_s3 = inlined_call_operand.hbm [shape: f32[256,128], index: 3, kind: input, shape index: {}]   ;;  %s641_s4 = inlined_call_operand.vmem [shape: f32[1,128], index: 4, kind: input, shape index: {}]   ;;  %s642_s5 = inlined_call_operand.hbm [shape: f32[48,128], index: 5, kind: output, shape index: {}]  }
   0x1   :  { %11 = vsyncpa [#allocation5], 0  ;;  %s530_s18 = smov [#allocation3]   ;;  %s482_s22 = scalar_lea.hbm %s640_s3, 4096 }
   0x2   :  { %s23_s19 = sshll.u32 %s530_s18, 4  ;;  %p483_p0 = scmp.ne.s32.totalorder %s640_s3, %s482_s22  ;;  %s24_s19 = int_to_ptr.vmem [resolvable:$true] %s23_s19 }
   0x3   :  { %p486_p1 = scmp.lt.u32.totalorder %s482_s22, %s640_s3 }
   0x5   :  { %p488_p2 = pnand %p486_p1, %p483_p0 }
   0x7   :  { %491 = shalt.err (!%p488_p2)
}
   0x8   :  { %s492_s27 = scalar_lea.vmem %s24_s19, 4096  ;;  %p497_p4 = scmp.lt.s32.totalorder %s24_s19, %s24_s19 }
   0x9   :  { %p493_p3 = scmp.ne.s32.totalorder %s24_s19, %s492_s27  ;;  %p498_p5 = scmp.lt.s32.totalorder %s492_s27, %s492_s27 }
   0xb   :  { %p499_p6 = por %p498_p5, %p497_p4 }
   0xd   :  { %p500_p7 = pnand %p499_p6, %p493_p3 }
   0xf   :  { %503 = shalt.err (!%p500_p7)
}
  0x10   :  { %s531_s28 = smov 128   ;;  %s532_s29 = smov 8  }
  0x11   :  { %29 = dma.hbm_to_vmem [thread:$0]  %s640_s3, 4096, %s24_s19, [#allocation4], %s531_s28, %s531_s28, %s532_s29  }
  0x12   :  { %526 = dma.done.wait [#allocation4], 4096  }
  0x13   :  { %527 = vsyncadd [#allocation4], 4294963200  ;;  %v533_v0 = vmov 0.0   ;;  %v46_v1 = vld [vmem:[%s638_s1 + $0x8] sm:$0xff]  ;;  %v45_v2 = vld [vmem:[%s638_s1] sm:$0xff]  ;;  %vm59_vm0 = vcmask 64512   ;;  %v49_v57 = vlaneseq }
  0x14   :  { %142 = vmatprep.mubr.f32.mxu0 %v533_v0  ;;  %v39_v3 = vld [vmem:[%s637_s0] sm:$0xff]  ;;  %78 = vmatprep.subr.mxu0 %v46_v1  ;;  %v232_v5 = vld [vmem:[#allocation3 + $0x88] sm:$0xff]  ;;  %v233_v11 = vld [vmem:[#allocation3 + $0x90] sm:$0xff] }
  0x15   :  { %79 = vmatpush1.msra.mxu0 %v45_v2  ;;  %v231_v4 = vld [vmem:[#allocation3 + $0x80] sm:$0xff]  ;;  %v216_v7 = vld [vmem:[#allocation3 + $0x8] sm:$0xff]  ;;  %v234_v12 = vld [vmem:[#allocation3 + $0x98] sm:$0xff]  ;;  %v50_v58 = vshrl.u32 %v49_v57, 7 }
  0x16   :  { %372 = vmatmul.mubr.msk.f32.vlgmr.msra.gmra.mrb[0].mxu0 %vm59_vm0, %v39_v3  ;;  %v215_v6 = vld [vmem:[#allocation3] sm:$0xff]  ;;  %v40_v8 = vld [vmem:[%s637_s0 + $0x8] sm:$0xff]  ;;  %v429_v9 = vpack.c.bf16 %v232_v5, %v231_v4  ;;  %v433_v13 = vpack.c.bf16 %v234_v12, %v233_v11  ;;  %v217_v14 = vld [vmem:[#allocation3 + $0x10] sm:$0xff] }
  0x17   :  { %148 = vmatprep.mubr.f32.mxu0 %v533_v0  ;;  %v431_v10 = vpack.c.bf16 %v216_v7, %v215_v6  ;;  %v218_v15 = vld [vmem:[#allocation3 + $0x18] sm:$0xff]  ;;  %v235_v16 = vld [vmem:[#allocation3 + $0xa0] sm:$0xff]  ;;  %v236_v17 = vld [vmem:[#allocation3 + $0xa8] sm:$0xff]  ;;  %v51_v59 = vsub.s32 0, %v50_v58  ;;  %v55_v61 = vsub.s32 1, %v50_v58 }
  0x18   :  { %430 = vmatprep.subr.bf16.mxu0 %v429_v9  ;;  %461 = vmatprep.subr.bf16.mxu1 %v429_v9  ;;  %v41_v18 = vld [vmem:[%s637_s0 + $0x10] sm:$0xff]  ;;  %v435_v19 = vpack.c.bf16 %v218_v15, %v217_v14  ;;  %v437_v20 = vpack.c.bf16 %v236_v17, %v235_v16  ;;  %v219_v21 = vld [vmem:[#allocation3 + $0x20] sm:$0xff]  ;;  %v220_v22 = vld [vmem:[#allocation3 + $0x28] sm:$0xff] }
  0x19   :  { %469 = vmatpush3.bf16.msra.mxu1 %v431_v10  ;;  %432 = vmatpush3.bf16.msra.mxu0 %v431_v10  ;;  %v237_v23 = vld [vmem:[#allocation3 + $0xb0] sm:$0xff]  ;;  %v238_v24 = vld [vmem:[#allocation3 + $0xb8] sm:$0xff]  ;;  %v439_v26 = vpack.c.bf16 %v220_v22, %v219_v21  ;;  %v239_v30 = vld [vmem:[#allocation3 + $0xc0] sm:$0xff] }
  0x1a   :  { %373 = vmatmul.mubr.msk.f32.gmra.mrb[2].mxu0 %vm59_vm0, %v40_v8  ;;  %434 = vmatprep.subr.bf16.mxu0 %v433_v13  ;;  %v42_v25 = vld [vmem:[%s637_s0 + $0x18] sm:$0xff]  ;;  %v441_v27 = vpack.c.bf16 %v238_v24, %v237_v23  ;;  %v221_v28 = vld [vmem:[#allocation3 + $0x30] sm:$0xff]  ;;  %v240_v31 = vld [vmem:[#allocation3 + $0xc8] sm:$0xff] }
  0x1b   :  { %154 = vmatprep.mubr.f32.mxu0 %v533_v0  ;;  %462 = vmatprep.subr.bf16.mxu1 %v433_v13  ;;  %v222_v29 = vld [vmem:[#allocation3 + $0x38] sm:$0xff]  ;;  %v43_v32 = vld [vmem:[%s637_s0 + $0x20] sm:$0xff]  ;;  %v445_v34 = vpack.c.bf16 %v240_v31, %v239_v30  ;;  %v224_v36 = vld [vmem:[#allocation3 + $0x48] sm:$0xff] }
  0x1c   :  { %v443_v33 = vpack.c.bf16 %v222_v29, %v221_v28  ;;  %v223_v35 = vld [vmem:[#allocation3 + $0x40] sm:$0xff]  ;;  %v241_v37 = vld [vmem:[#allocation3 + $0xd0] sm:$0xff]  ;;  %v242_v38 = vld [vmem:[#allocation3 + $0xd8] sm:$0xff] }
  0x1d   :  { %470 = vmatpush3.bf16.msra.mxu1 %v435_v19  ;;  %436 = vmatpush3.bf16.msra.mxu0 %v435_v19  ;;  %v44_v39 = vld [vmem:[%s637_s0 + $0x28] sm:$0xff]  ;;  %v447_v40 = vpack.c.bf16 %v224_v36, %v223_v35  ;;  %v449_v41 = vpack.c.bf16 %v242_v38, %v241_v37  ;;  %v225_v42 = vld [vmem:[#allocation3 + $0x50] sm:$0xff]  ;;  %v226_v43 = vld [vmem:[#allocation3 + $0x58] sm:$0xff] }
  0x1e   :  { %374 = vmatmul.mubr.msk.f32.gmra.mrb[4].mxu0 %vm59_vm0, %v41_v18  ;;  %438 = vmatprep.subr.bf16.mxu0 %v437_v20  ;;  %v243_v44 = vld [vmem:[#allocation3 + $0xe0] sm:$0xff]  ;;  %v244_v45 = vld [vmem:[#allocation3 + $0xe8] sm:$0xff]  ;;  %v451_v46 = vpack.c.bf16 %v226_v43, %v225_v42  ;;  %v245_v51 = vld [vmem:[#allocation3 + $0xf0] sm:$0xff] }
  0x1f   :  { %160 = vmatprep.mubr.f32.mxu0 %v533_v0  ;;  %463 = vmatprep.subr.bf16.mxu1 %v437_v20  ;;  %v453_v47 = vpack.c.bf16 %v244_v45, %v243_v44  ;;  %v227_v48 = vld [vmem:[#allocation3 + $0x60] sm:$0xff]  ;;  %v228_v49 = vld [vmem:[#allocation3 + $0x68] sm:$0xff]  ;;  %v246_v52 = vld [vmem:[#allocation3 + $0xf8] sm:$0xff] }
  0x20   :  { %v455_v50 = vpack.c.bf16 %v228_v49, %v227_v48  ;;  %v457_v53 = vpack.c.bf16 %v246_v52, %v245_v51  ;;  %v229_v54 = vld [vmem:[#allocation3 + $0x70] sm:$0xff]  ;;  %v230_v55 = vld [vmem:[#allocation3 + $0x78] sm:$0xff]  ;;  %v47_v60 = vld [vmem:[%s639_s2] sm:$0x3] }
  0x21   :  { %471 = vmatpush3.bf16.msra.mxu1 %v439_v26  ;;  %440 = vmatpush3.bf16.msra.mxu0 %v439_v26  ;;  %v459_v56 = vpack.c.bf16 %v230_v55, %v229_v54  ;;  %v52_v62 = vrot.slane %v47_v60, %v51_v59  ;;  %v56_v63 = vrot.slane %v47_v60, %v55_v61  ;;  %v378_v37 = vld [vmem:[%s641_s4] ss:$0 sm:$0xff]  ;;  %s534_s4 = smov [#allocation6]  }
  0x22   :  { %375 = vmatmul.mubr.msk.f32.gmra.mrb[6].mxu0 %vm59_vm0, %v42_v25  ;;  %442 = vmatprep.subr.bf16.mxu0 %v441_v27  ;;  %s360_s23 = sshll.u32 %s534_s4, 4  ;;  %s361_s23 = int_to_ptr.vmem [resolvable:$true] %s360_s23 }
  0x23   :  { %166 = vmatprep.mubr.f32.mxu0 %v533_v0  ;;  %464 = vmatprep.subr.bf16.mxu1 %v441_v27  ;;  %s504_s24 = scalar_lea.vmem %s361_s23, 768  ;;  %p509_p9 = scmp.lt.s32.totalorder %s361_s23, %s361_s23 }
  0x24   :  { %p505_p8 = scmp.ne.s32.totalorder %s361_s23, %s504_s24  ;;  %p510_p10 = scmp.lt.s32.totalorder %s504_s24, %s504_s24 }
  0x25   :  { %472 = vmatpush3.bf16.msra.mxu1 %v443_v33  ;;  %444 = vmatpush3.bf16.msra.mxu0 %v443_v33 }
  0x26   :  { %376 = vmatmul.mubr.msk.f32.gmra.mrb[8].mxu0 %vm59_vm0, %v43_v32  ;;  %446 = vmatprep.subr.bf16.mxu0 %v445_v34  ;;  %p511_p11 = por %p510_p10, %p509_p9 }
  0x27   :  { %172 = vmatprep.mubr.f32.mxu0 %v533_v0  ;;  %465 = vmatprep.subr.bf16.mxu1 %v445_v34 }
  0x28   :  { %p512_p12 = pnand %p511_p11, %p505_p8 }
  0x29   :  { %473 = vmatpush3.bf16.msra.mxu1 %v447_v40  ;;  %448 = vmatpush3.bf16.msra.mxu0 %v447_v40 }
  0x2a   :  { %377 = vmatmul.mubr.msk.f32.gmra.mrb[10].mxu0 %vm59_vm0, %v44_v39  ;;  %466 = vmatprep.subr.bf16.mxu1 %v449_v41 }
  0x2b   :  { %450 = vmatprep.subr.bf16.mxu0 %v449_v41 }
  0x2d   :  { %474 = vmatpush3.bf16.msra.mxu1 %v451_v46  ;;  %452 = vmatpush3.bf16.msra.mxu0 %v451_v46 }
  0x2e   :  { %467 = vmatprep.subr.bf16.mxu1 %v453_v47  ;;  %454 = vmatprep.subr.bf16.mxu0 %v453_v47 }
  0x31   :  { %456 = vmatpush3.bf16.msra.mxu0 %v455_v50  ;;  %475 = vmatpush3.bf16.msra.mxu1 %v455_v50 }
  0x32   :  { %458 = vmatprep.subr.bf16.mxu0 %v457_v53  ;;  %468 = vmatprep.subr.bf16.mxu1 %v457_v53 }
  0x35   :  { %460 = vmatpush3.bf16.msra.mxu0 %v459_v56  ;;  %476 = vmatpush3.bf16.msra.mxu1 %v459_v56 }
  0xe9   :  { %v144_v0 = vpop.f32.mrb[0].mxu0 }
  0xea   :  { %v145_v1 = vadd.f32 %v144_v0, %v52_v62  ;;  %v146_v2 = vpop.f32.mrb[1].mxu0 }
  0xeb   :  { %v147_v3 = vadd.f32 %v146_v2, %v56_v63 }
  0xec   :  { %v179_v6 = vmax.f32 %v145_v1, 0.0 }
  0xed   :  { %v180_v4 = vmax.f32 %v147_v3, 0.0  ;;  %v150_v5 = vpop.f32.mrb[2].mxu0 }
  0xee   :  { %v151_v7 = vadd.f32 %v150_v5, %v52_v62  ;;  %v152_v8 = vpop.f32.mrb[3].mxu0 }
  0xef   :  { %v153_v9 = vadd.f32 %v152_v8, %v56_v63  ;;  %318 = vmatprep.mubr.f32.mxu0 %v180_v4 }
  0xf0   :  { %319 = vmatmul.mubr.f32.vlgmr.msra.gmra.mrb[12].mxu0 %v179_v6  ;;  %v181_v12 = vmax.f32 %v151_v7, 0.0 }
  0xf1   :  { %v182_v10 = vmax.f32 %v153_v9, 0.0  ;;  %v156_v11 = vpop.f32.mrb[4].mxu0 }
  0xf2   :  { %v157_v13 = vadd.f32 %v156_v11, %v52_v62  ;;  %v158_v14 = vpop.f32.mrb[5].mxu0 }
  0xf3   :  { %323 = vmatprep.mubr.f32.mxu0 %v182_v10  ;;  %v159_v15 = vadd.f32 %v158_v14, %v56_v63 }
  0xf4   :  { %324 = vmatmul.mubr.f32.gmra.mrb[14].mxu0 %v181_v12  ;;  %v183_v18 = vmax.f32 %v157_v13, 0.0 }
  0xf5   :  { %v162_v16 = vpop.f32.mrb[6].mxu0  ;;  %v184_v17 = vmax.f32 %v159_v15, 0.0 }
  0xf6   :  { %v163_v19 = vadd.f32 %v162_v16, %v52_v62  ;;  %v164_v20 = vpop.f32.mrb[7].mxu0 }
  0xf7   :  { %v165_v21 = vadd.f32 %v164_v20, %v56_v63  ;;  %328 = vmatprep.mubr.f32.mxu1 %v184_v17 }
  0xf8   :  { %329 = vmatmul.mubr.f32.vlgmr.msra.gmra.mrb[0].mxu1 %v183_v18  ;;  %v185_v24 = vmax.f32 %v163_v19, 0.0 }
  0xf9   :  { %v186_v22 = vmax.f32 %v165_v21, 0.0  ;;  %v168_v23 = vpop.f32.mrb[8].mxu0 }
  0xfa   :  { %v169_v25 = vadd.f32 %v168_v23, %v52_v62  ;;  %v170_v26 = vpop.f32.mrb[9].mxu0 }
  0xfb   :  { %v171_v27 = vadd.f32 %v170_v26, %v56_v63  ;;  %333 = vmatprep.mubr.f32.mxu1 %v186_v22 }
  0xfc   :  { %334 = vmatmul.mubr.f32.gmra.mrb[2].mxu1 %v185_v24  ;;  %v187_v30 = vmax.f32 %v169_v25, 0.0 }
  0xfd   :  { %v188_v28 = vmax.f32 %v171_v27, 0.0  ;;  %v174_v29 = vpop.f32.mrb[10].mxu0 }
  0xfe   :  { %v175_v31 = vadd.f32 %v174_v29, %v52_v62  ;;  %v176_v32 = vpop.f32.mrb[11].mxu0 }
  0xff   :  { %v177_v33 = vadd.f32 %v176_v32, %v56_v63  ;;  %338 = vmatprep.mubr.f32.mxu1 %v188_v28 }
 0x100   :  { %339 = vmatmul.mubr.f32.gmra.mrb[4].mxu1 %v187_v30  ;;  %v189_v35 = vmax.f32 %v175_v31, 0.0 }
 0x101   :  { %v190_v34 = vmax.f32 %v177_v33, 0.0 }
 0x103   :  { %343 = vmatprep.mubr.f32.mxu1 %v190_v34 }
 0x104   :  { %344 = vmatmul.mubr.f32.gmra.mrb[6].mxu1 %v189_v35 }
 0x1c3   :  { %v411_v36 = vpop.f32.mrb[12].mxu0 }
 0x1c4   :  { %v412_v38 = vpop.f32.mrb[13].mxu0 }
 0x1c5   :  { %v413_v39 = vadd.f32 %v412_v38, %v411_v36 }
 0x1c7   :  { %v321_v40 = vadd.f32 %v413_v39, %v378_v37  ;;  %v414_v41 = vpop.f32.mrb[14].mxu0 }
 0x1c8   :  { %v415_v42 = vpop.f32.mrb[15].mxu0 }
 0x1c9   :  { %349 = vst [vmem:[#allocation6] sm:$0xff] %v321_v40  ;;  %v416_v43 = vadd.f32 %v415_v42, %v414_v41 }
 0x1cb   :  { %v326_v44 = vadd.f32 %v416_v43, %v378_v37  ;;  %v417_v45 = vpop.f32.mrb[0].mxu1 }
 0x1cc   :  { %v418_v46 = vpop.f32.mrb[1].mxu1 }
 0x1cd   :  { %350 = vst [vmem:[#allocation6 + $0x8] sm:$0xff] %v326_v44  ;;  %v419_v47 = vadd.f32 %v418_v46, %v417_v45 }
 0x1cf   :  { %v331_v48 = vadd.f32 %v419_v47, %v378_v37  ;;  %v420_v49 = vpop.f32.mrb[2].mxu1 }
 0x1d0   :  { %v421_v50 = vpop.f32.mrb[3].mxu1 }
 0x1d1   :  { %351 = vst [vmem:[#allocation6 + $0x10] sm:$0xff] %v331_v48  ;;  %v422_v51 = vadd.f32 %v421_v50, %v420_v49 }
 0x1d3   :  { %v336_v52 = vadd.f32 %v422_v51, %v378_v37  ;;  %v423_v53 = vpop.f32.mrb[4].mxu1 }
 0x1d4   :  { %v424_v54 = vpop.f32.mrb[5].mxu1 }
 0x1d5   :  { %352 = vst [vmem:[#allocation6 + $0x18] sm:$0xff] %v336_v52  ;;  %v425_v55 = vadd.f32 %v424_v54, %v423_v53 }
 0x1d7   :  { %v341_v56 = vadd.f32 %v425_v55, %v378_v37  ;;  %v426_v57 = vpop.f32.mrb[6].mxu1 }
 0x1d8   :  { %v427_v58 = vpop.f32.mrb[7].mxu1 }
 0x1d9   :  { %353 = vst [vmem:[#allocation6 + $0x20] sm:$0xff] %v341_v56  ;;  %v428_v59 = vadd.f32 %v427_v58, %v426_v57 }
 0x1db   :  { %v346_v60 = vadd.f32 %v428_v59, %v378_v37 }
 0x1dd   :  { %354 = vst [vmem:[#allocation6 + $0x28] sm:$0xff] %v346_v60 }
 0x1de   :  { %515 = shalt.err (!%p512_p12)
}
 0x1df   :  { %s516_s27 = scalar_lea.hbm %s642_s5, 768 }
 0x1e0   :  { %p517_p13 = scmp.ne.s32.totalorder %s642_s5, %s516_s27  ;;  %p520_p0 = scmp.lt.u32.totalorder %s516_s27, %s642_s5 }
 0x1e2   :  { %p522_p1 = pnand %p520_p0, %p517_p13 }
 0x1e4   :  { %525 = shalt.err (!%p522_p1)
}
 0x1e5   :  { %366 = dma.vmem_to_hbm [thread:$0]  %s361_s23, 768, %s642_s5, [#allocation5], %s531_s28, %s531_s28, %s532_s29  }
 0x1e6   :  { %528 = dma.done.wait [#allocation5], 768  }
 0x1e7   :  { %529 = vsyncadd [#allocation5], 4294966528 }
 0x1e8   :  { %370 = vsyncpa [#allocation4], 1 }
 0x1e9   :  { %371 = vsyncpa [#allocation5], 1 }

</bundles_post_ra>
